<compile_context>
chip_gen: v7x
topology: tpu7x:2x2x1
jax: 0.10.0
libtpu: 0.0.40
codegen_flags: <defaults>
</compile_context>

<pallas_src>
import functools

import jax
import jax.numpy as jnp
from jax import lax
from jax.experimental import pallas as pl
from jax.experimental.pallas import tpu as pltpu

_EPS = 1e-12  # torch.nn.functional.normalize default eps


def _swa_kernel(gamma_ref, x_ref, w_ref, b_ref, o_ref,
                qn_ref, kn_ref, va_ref, *, cr, tq):
    c = x_ref.shape[1]
    hw = x_ref.shape[2]
    t = pl.program_id(1)

    # --- once per batch: fused q/k/v projection + normalizations into scratch.
    @pl.when(t == 0)
    def _():
        x = x_ref[0]                                                   # (C, HW)
        qkv = jnp.dot(w_ref[...], x,
                      preferred_element_type=jnp.float32) + b_ref[...]  # (2Cr+C, HW)
        q = qkv[0:cr]                                                  # (Cr, HW)
        k = qkv[cr:2 * cr]                                             # (Cr, HW)
        v = qkv[2 * cr:]                                               # (C, HW)
        # F.normalize: q over channels (per spatial position), k over HW (per
        # channel).  max(sqrt(ss), eps) == sqrt(max(ss, eps^2)) -> use rsqrt.
        q_ss = jnp.sum(q * q, axis=0, keepdims=True)                   # (1, HW)
        qn_ref[...] = q * lax.rsqrt(jnp.maximum(q_ss, _EPS * _EPS))
        k_ss = jnp.sum(k * k, axis=1, keepdims=True)                   # (Cr, 1)
        kn_ref[...] = k * lax.rsqrt(jnp.maximum(k_ss, _EPS * _EPS))
        # v augmented with a ones row: the softmax denominators then fall out
        # of the same MXU matmul as the attention output, already lane-major
        # (no (Tq,1)->(1,Tq) relayout needed for the deferred normalization).
        va_ref[0:c, :] = v
        va_ref[c:c + 1, :] = jnp.ones((1, hw), jnp.float32)

    # --- per tile of Tq query rows.
    start = pl.multiple_of(t * tq, 128)
    qt = qn_ref[:, pl.ds(start, tq)]                                   # (Cr, Tq)
    # logits[i, j] = <qn[:, start+i], kn[:, j]>; TN contraction over the tiny
    # Cr axis -> only the Cr-row lhs needs any internal transpose.
    a = lax.dot_general(qt, kn_ref[...], (((0,), (0,)), ((), ())),
                        preferred_element_type=jnp.float32)            # (Tq, HW)
    a = a - jnp.max(a, axis=-1, keepdims=True)
    p = jnp.exp(a)                                                     # unnormalized softmax
    # [v; 1] @ p^T: rows 0..C-1 = unnormalized output, row C = row-sums of p.
    # TODO(synk): confirm via pl.lower_as_mlir that this NT contraction lowers
    # through the transposed weight latch (no explicit (Tq,HW) p transpose).
    oa = lax.dot_general(va_ref[...], p, (((1,), (1,)), ((), ())),
                         preferred_element_type=jnp.float32)           # (C+1, Tq)
    inv_den = pl.reciprocal(oa[c:c + 1, :], approx=True)               # (1, Tq)
    x_tile = x_ref[0, :, pl.ds(start, tq)]                             # (C, Tq)
    gamma = gamma_ref[0, 0]
    o_ref[0] = (gamma * (oa[0:c, :] * inv_den) + x_tile).astype(o_ref.dtype)


def spectral_wise_attention(x_nchw, w_qk, b_qk, w_v, b_v, *, gamma=1.0, tq=None):
    """x_nchw: (B, C, H, W) float32.
    w_qk: (2*Cr, C) squeezed 1x1 conv_qk weight, b_qk: (2*Cr,)
    w_v : (C, C)   squeezed 1x1 conv_v  weight, b_v : (C,)
    Returns (B, C, H, W)."""
    B, C, H, W = x_nchw.shape
    Cr = w_qk.shape[0] // 2
    HW = H * W

    x = x_nchw.reshape(B, C, HW)          # NCHW -> (B, C, HW): free reshape

    if tq is None:
        tq = 256 if HW % 256 == 0 else (128 if HW % 128 == 0 else HW)
    assert HW % tq == 0, "H*W must be divisible by the q-tile size"
    n_qt = HW // tq

    # Fuse the two 1x1 convs into one channel-mixing matmul (better MXU fill,
    # one weight/bias DMA instead of five tiny padded ones).
    w_fused = jnp.concatenate([w_qk, w_v], axis=0)                   # (2Cr+C, C)
    b_fused = jnp.concatenate([b_qk, b_v], axis=0).reshape(-1, 1)    # (2Cr+C, 1)
    gamma_arr = jnp.full((1, 1), gamma, dtype=jnp.float32)

    kernel = functools.partial(_swa_kernel, cr=Cr, tq=tq)

    # VMEM budget: x/out double buffers + fused weights + resident qkv scratch
    # + (Tq, HW) logits/exp temporaries (x3 headroom), 32 MiB floor.
    def rup(n, m):
        return -(-n // m) * m
    est = 4 * (2 * C * HW + 2 * C * tq
               + 2 * (2 * Cr + C) * max(C, 128)
               + (2 * rup(Cr, 8) + rup(C + 1, 8)) * HW
               + 3 * tq * HW)
    vmem_limit = int(min(128 * 1024 * 1024, max(32 * 1024 * 1024, 1.5 * est)))

    out = pl.pallas_call(
        kernel,
        out_shape=jax.ShapeDtypeStruct((B, C, HW), x.dtype),
        grid_spec=pltpu.PrefetchScalarGridSpec(
            num_scalar_prefetch=0,
            grid=(B, n_qt),
            in_specs=[
                pl.BlockSpec(memory_space=pltpu.MemorySpace.SMEM),    # gamma
                pl.BlockSpec((1, C, HW), lambda b, t: (b, 0, 0)),     # x (resident per batch)
                pl.BlockSpec((2 * Cr + C, C), lambda b, t: (0, 0)),   # fused qkv weight
                pl.BlockSpec((2 * Cr + C, 1), lambda b, t: (0, 0)),   # fused qkv bias
            ],
            out_specs=pl.BlockSpec((1, C, tq), lambda b, t: (b, 0, t)),
            scratch_shapes=[
                pltpu.VMEM((Cr, HW), jnp.float32),      # qn (normalized q)
                pltpu.VMEM((Cr, HW), jnp.float32),      # kn (normalized k)
                pltpu.VMEM((C + 1, HW), jnp.float32),   # [v; 1]
            ],
        ),
        compiler_params=pltpu.CompilerParams(
            dimension_semantics=("parallel", "arbitrary"),
            vmem_limit_bytes=vmem_limit),
    )(gamma_arr, x, w_fused, b_fused)

    return out.reshape(B, C, H, W)


def _reference(x, w_qk, b_qk, w_v, b_v, gamma):
    # Pure-JAX replica of the PyTorch forward (high precision matmuls).
    B, C, H, W = x.shape
    Cr = w_qk.shape[0] // 2
    HW = H * W
    hp = lax.Precision.HIGHEST
    xf = x.reshape(B, C, HW)
    qk = jnp.einsum('oc,bcs->bos', w_qk, xf, precision=hp) + b_qk[None, :, None]
    q, k = qk[:, :Cr], qk[:, Cr:]
    v = jnp.einsum('oc,bcs->bos', w_v, xf, precision=hp) + b_v[None, :, None]
    q = jnp.transpose(q, (0, 2, 1))                                    # (B, HW, Cr)
    q = q / jnp.maximum(jnp.linalg.norm(q, axis=-1, keepdims=True), _EPS)
    k = k / jnp.maximum(jnp.linalg.norm(k, axis=-1, keepdims=True), _EPS)
    attn = jnp.einsum('bir,brj->bij', q, k, precision=hp)              # (B, HW, HW)
    attn = jax.nn.softmax(attn, axis=-1)
    out = jnp.einsum('bcj,bij->bci', v, attn, precision=hp)            # (B, C, HW)
    return (gamma * out + xf).reshape(B, C, H, W)


if __name__ == "__main__":
    B, C, H, W = 2, 32, 16, 16
    reduction = 8
    Cr = C // reduction
    gamma = 0.75

    key = jax.random.PRNGKey(0)
    kx, k1, kb1, k2, kb2 = jax.random.split(key, 5)

    x = jax.random.normal(kx, (B, C, H, W), dtype=jnp.float32)
    # 1x1 conv weights (PyTorch shape (out, in, 1, 1)) squeezed to (out, in).
    w_qk = jax.random.normal(k1, (2 * Cr, C), dtype=jnp.float32) * 0.1
    b_qk = jax.random.normal(kb1, (2 * Cr,), dtype=jnp.float32) * 0.1
    w_v = jax.random.normal(k2, (C, C), dtype=jnp.float32) * 0.1
    b_v = jax.random.normal(kb2, (C,), dtype=jnp.float32) * 0.1

    # tq=128 exercises the multi-tile (flash-style) path: HW=256 -> 2 q tiles.
    out = jax.block_until_ready(
        spectral_wise_attention(x, w_qk, b_qk, w_v, b_v, gamma=gamma, tq=128))
    ref = jax.block_until_ready(_reference(x, w_qk, b_qk, w_v, b_v, gamma))

    assert out.shape == (B, C, H, W)
    # Tolerance covers MXU default-precision f32 matmuls + EUP rsqrt/approx-
    # reciprocal vs the HIGHEST-precision XLA reference; real algorithmic
    # errors are orders of magnitude larger.
    assert jnp.allclose(out, ref, atol=3e-3, rtol=3e-3), "mismatch vs reference"
    print("KERNEL_OK")
</pallas_src>

<mosaic_0001>
module attributes {stable_mosaic.version = 11 : i64} {
  func.func @_swa_kernel(%arg0: i32, %arg1: i32, %arg2: memref<1x1xf32, #tpu.memory_space<smem>>, %arg3: memref<1x32x256xf32, #tpu.memory_space<vmem>>, %arg4: memref<40x32xf32, #tpu.memory_space<vmem>>, %arg5: memref<40x1xf32, #tpu.memory_space<vmem>>, %arg6: memref<1x32x128xf32, #tpu.memory_space<vmem>>, %arg7: memref<4x256xf32, #tpu.memory_space<vmem>>, %arg8: memref<4x256xf32, #tpu.memory_space<vmem>>, %arg9: memref<33x256xf32, #tpu.memory_space<vmem>>) attributes {dimension_semantics = [#tpu.dimension_semantics<parallel>, #tpu.dimension_semantics<arbitrary>], iteration_bounds = array<i64: 2, 2>, scalar_prefetch = 0 : i64, scratch_operands = 3 : i64, tpu.core_type = #tpu.core_type<tc>, window_params = [{transform_indices = @transform_0, window_bounds = array<i64: 1, 1>}, {transform_indices = @transform_1, window_bounds = array<i64: 1, 32, 256>}, {pipeline_mode = #tpu.pipeline_mode<synchronous>, transform_indices = @transform_2, window_bounds = array<i64: 40, 32>}, {pipeline_mode = #tpu.pipeline_mode<synchronous>, transform_indices = @transform_3, window_bounds = array<i64: 40, 1>}, {transform_indices = @transform_4, window_bounds = array<i64: 1, 32, 128>}]} {
    %c0_i32 = arith.constant 0 : i32
    %0 = arith.cmpi eq, %arg1, %c0_i32 : i32
    %1 = arith.extui %0 : i1 to i32
    %c0_i32_0 = arith.constant 0 : i32
    %2 = arith.cmpi ne, %1, %c0_i32_0 : i32
    scf.if %2 {
      %c0_14 = arith.constant 0 : index
      %c0_15 = arith.constant 0 : index
      %c0_16 = arith.constant 0 : index
      %31 = vector.load %arg3[%c0_14, %c0_15, %c0_16] : memref<1x32x256xf32, #tpu.memory_space<vmem>>, vector<1x32x256xf32>
      %32 = vector.shape_cast %31 : vector<1x32x256xf32> to vector<32x256xf32>
      %c0_17 = arith.constant 0 : index
      %c0_18 = arith.constant 0 : index
      %33 = vector.load %arg4[%c0_17, %c0_18] : memref<40x32xf32, #tpu.memory_space<vmem>>, vector<40x32xf32>
      %cst_19 = arith.constant dense<0.000000e+00> : vector<40x256xf32>
      %34 = tpu.matmul %33, %32, %cst_19 {dimension_numbers = #tpu.dot_dimension_numbers<[1], [0], [0], [1], [0, 0, 1, 1], [], []>} : vector<40x32xf32>, vector<32x256xf32>, vector<40x256xf32> -> vector<40x256xf32>
      %c0_20 = arith.constant 0 : index
      %c0_21 = arith.constant 0 : index
      %35 = vector.load %arg5[%c0_20, %c0_21] : memref<40x1xf32, #tpu.memory_space<vmem>>, vector<40x1xf32>
      %36 = vector.broadcast %35 : vector<40x1xf32> to vector<40x256xf32>
      %37 = arith.addf %34, %36 : vector<40x256xf32>
      %38 = vector.extract_strided_slice %37 {offsets = [0, 0], sizes = [4, 256], strides = [1, 1]} : vector<40x256xf32> to vector<4x256xf32>
      %39 = vector.extract_strided_slice %37 {offsets = [4, 0], sizes = [4, 256], strides = [1, 1]} : vector<40x256xf32> to vector<4x256xf32>
      %40 = vector.extract_strided_slice %37 {offsets = [8, 0], sizes = [32, 256], strides = [1, 1]} : vector<40x256xf32> to vector<32x256xf32>
      %41 = arith.mulf %38, %38 : vector<4x256xf32>
      %cst_22 = arith.constant dense<0.000000e+00> : vector<256xf32>
      %42 = vector.multi_reduction <add>, %41, %cst_22 [0] : vector<4x256xf32> to vector<256xf32>
      %43 = vector.shape_cast %42 : vector<256xf32> to vector<1x256xf32>
      %cst_23 = arith.constant 1.000000e-24 : f32
      %44 = vector.broadcast %cst_23 : f32 to vector<1x256xf32>
      %45 = arith.maximumf %43, %44 : vector<1x256xf32>
      %46 = math.rsqrt %45 : vector<1x256xf32>
      %47 = vector.broadcast %46 : vector<1x256xf32> to vector<4x256xf32>
      %48 = arith.mulf %38, %47 : vector<4x256xf32>
      %c0_24 = arith.constant 0 : index
      %c0_25 = arith.constant 0 : index
      %49 = vector.load %arg7[%c0_24, %c0_25] : memref<4x256xf32, #tpu.memory_space<vmem>>, vector<4x256xf32>
      tpu.vector_store %arg7[%c0_24, %c0_25], %48 {strides = array<i32>} : memref<4x256xf32, #tpu.memory_space<vmem>>, vector<4x256xf32>,
      %50 = arith.mulf %39, %39 : vector<4x256xf32>
      %cst_26 = arith.constant dense<0.000000e+00> : vector<4xf32>
      %51 = vector.multi_reduction <add>, %50, %cst_26 [1] : vector<4x256xf32> to vector<4xf32>
      %52 = vector.shape_cast %51 : vector<4xf32> to vector<4x1xf32>
      %cst_27 = arith.constant 1.000000e-24 : f32
      %53 = vector.broadcast %cst_27 : f32 to vector<4x1xf32>
      %54 = arith.maximumf %52, %53 : vector<4x1xf32>
      %55 = math.rsqrt %54 : vector<4x1xf32>
      %56 = vector.broadcast %55 : vector<4x1xf32> to vector<4x256xf32>
      %57 = arith.mulf %39, %56 : vector<4x256xf32>
      %c0_28 = arith.constant 0 : index
      %c0_29 = arith.constant 0 : index
      %58 = vector.load %arg8[%c0_28, %c0_29] : memref<4x256xf32, #tpu.memory_space<vmem>>, vector<4x256xf32>
      tpu.vector_store %arg8[%c0_28, %c0_29], %57 {strides = array<i32>} : memref<4x256xf32, #tpu.memory_space<vmem>>, vector<4x256xf32>,
      %c0_30 = arith.constant 0 : index
      %c0_31 = arith.constant 0 : index
      %59 = vector.load %arg9[%c0_30, %c0_31] : memref<33x256xf32, #tpu.memory_space<vmem>>, vector<32x256xf32>
      tpu.vector_store %arg9[%c0_30, %c0_31], %40 {strides = array<i32>} : memref<33x256xf32, #tpu.memory_space<vmem>>, vector<32x256xf32>,
      %cst_32 = arith.constant 1.000000e+00 : f32
      %60 = vector.broadcast %cst_32 : f32 to vector<1x256xf32>
      %c32 = arith.constant 32 : index
      %c0_33 = arith.constant 0 : index
      %61 = vector.load %arg9[%c32, %c0_33] : memref<33x256xf32, #tpu.memory_space<vmem>>, vector<1x256xf32>
      tpu.vector_store %arg9[%c32, %c0_33], %60 {strides = array<i32>} : memref<33x256xf32, #tpu.memory_space<vmem>>, vector<1x256xf32>,
    } else {
    }
    %c128_i32 = arith.constant 128 : i32
    %3 = arith.muli %arg1, %c128_i32 : i32
    %4 = tpu.assume_multiple %3, 128 : i32
    %c0 = arith.constant 0 : index
    %5 = arith.index_cast %4 : i32 to index
    %6 = vector.load %arg7[%c0, %5] : memref<4x256xf32, #tpu.memory_space<vmem>>, vector<4x128xf32>
    %c0_1 = arith.constant 0 : index
    %c0_2 = arith.constant 0 : index
    %7 = vector.load %arg8[%c0_1, %c0_2] : memref<4x256xf32, #tpu.memory_space<vmem>>, vector<4x256xf32>
    %cst = arith.constant dense<0.000000e+00> : vector<128x256xf32>
    %8 = tpu.matmul %6, %7, %cst {dimension_numbers = #tpu.dot_dimension_numbers<[0], [0], [1], [1], [0, 1, 1, 1], [], []>} : vector<4x128xf32>, vector<4x256xf32>, vector<128x256xf32> -> vector<128x256xf32>
    %cst_3 = arith.constant dense<0xFF800000> : vector<128xf32>
    %9 = vector.multi_reduction <maximumf>, %8, %cst_3 [1] : vector<128x256xf32> to vector<128xf32>
    %10 = vector.shape_cast %9 : vector<128xf32> to vector<128x1xf32>
    %11 = vector.broadcast %10 : vector<128x1xf32> to vector<128x256xf32>
    %12 = arith.subf %8, %11 : vector<128x256xf32>
    %13 = math.exp %12 : vector<128x256xf32>
    %c0_4 = arith.constant 0 : index
    %c0_5 = arith.constant 0 : index
    %14 = vector.load %arg9[%c0_4, %c0_5] : memref<33x256xf32, #tpu.memory_space<vmem>>, vector<33x256xf32>
    %cst_6 = arith.constant dense<0.000000e+00> : vector<33x128xf32>
    %15 = tpu.matmul %14, %13, %cst_6 {dimension_numbers = #tpu.dot_dimension_numbers<[1], [1], [0], [0], [0, 0, 1, 0], [], []>} : vector<33x256xf32>, vector<128x256xf32>, vector<33x128xf32> -> vector<33x128xf32>
    %16 = vector.extract_strided_slice %15 {offsets = [32, 0], sizes = [1, 128], strides = [1, 1]} : vector<33x128xf32> to vector<1x128xf32>
    %17 = tpu.reciprocal %16 {approx = true} : vector<1x128xf32> -> vector<1x128xf32>
    %c0_7 = arith.constant 0 : index
    %c0_8 = arith.constant 0 : index
    %18 = arith.index_cast %4 : i32 to index
    %19 = vector.load %arg3[%c0_7, %c0_8, %18] : memref<1x32x256xf32, #tpu.memory_space<vmem>>, vector<1x32x128xf32>
    %20 = vector.shape_cast %19 : vector<1x32x128xf32> to vector<32x128xf32>
    %c0_9 = arith.constant 0 : index
    %c0_10 = arith.constant 0 : index
    %21 = memref.load %arg2[%c0_9, %c0_10] : memref<1x1xf32, #tpu.memory_space<smem>>
    %22 = vector.extract_strided_slice %15 {offsets = [0, 0], sizes = [32, 128], strides = [1, 1]} : vector<33x128xf32> to vector<32x128xf32>
    %23 = vector.broadcast %17 : vector<1x128xf32> to vector<32x128xf32>
    %24 = arith.mulf %22, %23 : vector<32x128xf32>
    %25 = vector.broadcast %21 : f32 to vector<32x128xf32>
    %26 = arith.mulf %25, %24 : vector<32x128xf32>
    %27 = arith.addf %26, %20 : vector<32x128xf32>
    %c0_11 = arith.constant 0 : index
    %c0_12 = arith.constant 0 : index
    %c0_13 = arith.constant 0 : index
    %28 = vector.load %arg6[%c0_11, %c0_12, %c0_13] : memref<1x32x128xf32, #tpu.memory_space<vmem>>, vector<1x32x128xf32>
    %29 = vector.shape_cast %28 : vector<1x32x128xf32> to vector<32x128xf32>
    %30 = vector.shape_cast %27 : vector<32x128xf32> to vector<1x32x128xf32>
    tpu.vector_store %arg6[%c0_11, %c0_12, %c0_13], %30 {strides = array<i32>} : memref<1x32x128xf32, #tpu.memory_space<vmem>>, vector<1x32x128xf32>,
    return
  }
  func.func @transform_0(%arg0: i32, %arg1: i32) -> (i32, i32) {
    %c0_i32 = arith.constant 0 : i32
    %c0_i32_0 = arith.constant 0 : i32
    %c0_i32_1 = arith.constant 0 : i32
    return %c0_i32, %c0_i32_0 : i32, i32
  }
  func.func @transform_1(%arg0: i32, %arg1: i32) -> (i32, i32, i32) {
    %c0_i32 = arith.constant 0 : i32
    %c0_i32_0 = arith.constant 0 : i32
    %c0_i32_1 = arith.constant 0 : i32
    return %arg0, %c0_i32, %c0_i32_0 : i32, i32, i32
  }
  func.func @transform_2(%arg0: i32, %arg1: i32) -> (i32, i32) {
    %c0_i32 = arith.constant 0 : i32
    %c0_i32_0 = arith.constant 0 : i32
    %c0_i32_1 = arith.constant 0 : i32
    return %c0_i32, %c0_i32_0 : i32, i32
  }
  func.func @transform_3(%arg0: i32, %arg1: i32) -> (i32, i32) {
    %c0_i32 = arith.constant 0 : i32
    %c0_i32_0 = arith.constant 0 : i32
    %c0_i32_1 = arith.constant 0 : i32
    return %c0_i32, %c0_i32_0 : i32, i32
  }
  func.func @transform_4(%arg0: i32, %arg1: i32) -> (i32, i32, i32) {
    %c0_i32 = arith.constant 0 : i32
    %c0_i32_0 = arith.constant 0 : i32
    return %arg0, %c0_i32, %arg1 : i32, i32, i32
  }
}

</mosaic_0001>

<bundles_post_ra>
// kernel: tpu_custom_call.1
= control target key start
LH: loop header
LB: loop body
LE: loop exit
PB: predicated region body
PF: predicated region fallthrough
CT: control target
= control target key end

     0   :  { %s1999_s0 = inlined_call_operand.<no memory space> [shape: f32[1,1], index: 0, kind: input, shape index: {}]   ;;  %s2000_s1 = inlined_call_operand.hbm [shape: f32[2,32,256], index: 1, kind: input, shape index: {}]   ;;  %s2001_s2 = inlined_call_operand.vmem [shape: f32[40,32], index: 2, kind: input, shape index: {}]   ;;  %s2002_s3 = inlined_call_operand.vmem [shape: f32[40,1], index: 3, kind: input, shape index: {}]   ;;  %s2003_s4 = inlined_call_operand.hbm [shape: f32[2,32,256], index: 4, kind: output, shape index: {}]  }
   0x1   :  { %9 = sst [smem:[#allocation5]] %s1999_s0 }
   0x2   :  { %10 = vsyncpa [#allocation7], 0 }
   0x3   :  { %12 = vsyncpa [#allocation7 + $0x1], 0 }
   0x4   :  { %13 = vsyncpa [#allocation8], 0 }
   0x5   :  { %15 = vsyncpa [#allocation8 + $0x1], 0  ;;  %s1563_s17 = smov 0   ;;  %s1565_s18 = smov 0  }
   0x6   :  { %s1567_s19 = smov 0   ;;  %s1569_s20 = smov 0  }
   0x7   :  { %s1571_s21 = smov 0   ;;  %s1573_s22 = smov 0  }
   0x8   :  { %s1575_s23 = smov 0   ;;  %s1577_s24 = smov 0  }
   0x9   :  { %s1579_s0 = smov 0   ;;  %s1581_s25 = smov 0  }
   0xa   :  { %s1583_s26 = smov 0  }
   0xb LB: > { %s1081_s27 = sadd.s32 4294967295, %s1522_s26   ;;  %s1082_s28 = sadd.s32 4294967294, %s1522_s26   ;;  %s1522_s26 = sphi %s1583_s26, %s21_s26   ;;  %s1518_s25 = sphi %s1581_s25, %s2025_s25   ;;  %s1514_s0 = sphi %s1579_s0, %s2024_s0   ;;  %s1510_s24 = sphi %s1577_s24, %s2023_s24   ;;  %s1506_s23 = sphi %s1575_s23, %s2022_s23   ;;  %s1502_s22 = sphi %s1573_s22, %s2021_s22   ;;  %s1498_s21 = sphi %s1571_s21, %s2020_s21   ;;  %s1494_s20 = sphi %s1569_s20, %s2019_s20   ;;  %s1490_s19 = sphi %s1567_s19, %s2018_s19   ;;  %s1486_s18 = sphi %s1565_s18, %s2017_s18   ;;  %s1482_s17 = sphi %s1563_s17, %s2016_s17  }
   0xc   : > { %s30_s29 = sadd.s32 1, %s1514_s0  ;;  %s33_s30 = sadd.s32 1, %s1518_s25 }
   0xd   : > { %p31_p0 = scmp.ge.s32.totalorder %s30_s29, 2  ;;  %s61_s5 = sadd.s32 1, %s1502_s22 }
   0xe   : > { %p68_p1 = scmp.ne.s32.totalorder %s1502_s22, %s1498_s21  ;;  %p69_p2 = scmp.eq.s32.totalorder %s1522_s26, 0 }
   0xf   : > { %s2027_s29 = smov (%p31_p0, %s30_s29), 0  ;;  %s2029_s30 = smov (!%p31_p0, %s33_s30), %s1518_s25 }
  0x10   : > { %p1627_p3 = por %p69_p2, %p68_p1  ;;  %p74_p4 = scmp.ne.s32.totalorder %s1498_s21, %s1494_s20 }
  0x11   : > { %p35_p5 = scmp.ge.s32.totalorder %s2029_s30, 2  ;;  %p75_p6 = scmp.eq.s32.totalorder %s1081_s27, 0 }
  0x12   : > { %s127_s7 = ssub.s32 %s1514_s0, %s2027_s29  ;;  %s131_s8 = sadd.s32 1, %s1490_s19 }
  0x13   : > { %s2031_s30 = smov (%p35_p5, %s2029_s30), 0  ;;  %p1637_p7 = por %p75_p6, %p74_p4 }
  0x14   : > { %2007 = sst [smem:[#allocation12_spill]] %s2031_s30  ;;  %p141_p8 = scmp.ne.s32.totalorder %s1490_s19, %s1486_s18 }
  0x15   : > { %s58_s10 = ssub.s32 %s1518_s25, %s2031_s30  ;;  %p142_p9 = scmp.eq.s32.totalorder %s1081_s27, 3 }
  0x16   : > { %p59_p10 = scmp.eq.s32.totalorder %s58_s10, 0  ;;  %s128_s11 = sor.u32 %s127_s7, %s58_s10 }
  0x17   : > { %p129_p11 = scmp.eq.s32.totalorder %s128_s11, 0  ;;  %p1645_p12 = por %p142_p9, %p141_p8 }
  0x18   : > { %s1650_s13 = scalar_select %p59_p10, %s1502_s22, %s61_s5  }
  0x19   : > { %s2009_s12 = scalar_select %p1645_p12, 1, 0 }
  0x1a   : > { %s1653_s14 = scalar_select %p129_p11, %s1490_s19, %s131_s8  }
  0x1b   : > { %p147_p13 = scmp.ne.s32.totalorder %s1486_s18, %s1482_s17  ;;  %p148_p0 = scmp.eq.s32.totalorder %s1082_s28, 3 }
  0x1c   : > { %p1196_p1 = scmp.lt.s32.totalorder %s1522_s26, 4  ;;  %s177_s16 = sand.u32 1, %s1502_s22  }
  0x1d   : > { %p1658_p2 = por %p148_p0, %p147_p13  ;;  %s1085_s20 = sshll.u32 %s177_s16, 6 }
  0x1e   : > { %s1123_s27 = sshll.u32 %s1518_s25, 10  ;;  %s181_s5 = scalar_lea.vmem [#allocation6], %s1085_s20 }
  0x1f   : > { %s2010_s15 = scalar_select %p1658_p2, 1, 0 }
  0x20   : > { %s1667_s11 = scalar_lea.hbm %s2000_s1, %s1123_s27  ;;  %s188_s8 = sshll.u32 %s181_s5, 4  ;;  %s1669_s8 = int_to_ptr.vmem [resolvable:$true] %s188_s8 }
  0x21   : > { %p1673_p4 = pnand %p1196_p1, %p1627_p3  ;;  %s1678_s30 = scalar_lea.sflag [#allocation7], %s177_s16 }
  0x22   : > { %s1370_s27 = scalar_lea.hbm %s1667_s11, 1024  ;;  %s1375_s6 = scalar_lea.hbm %s2000_s1, 2048 }
  0x23   : > { %p1371_p6 = scmp.ne.s32.totalorder %s1667_s11, %s1370_s27  ;;  %p1372_p8 = pneg %p1673_p4 }
  0x24   : > { %p1376_p3 = scmp.lt.u32.totalorder %s1667_s11, %s2000_s1  ;;  %p1377_p11 = scmp.lt.u32.totalorder %s1375_s6, %s1370_s27 }
  0x25   : > { %p1373_p9 = pnand %p1372_p8, %p1371_p6  ;;  %p1379_p0 = scmp.lt.u32.totalorder %s1370_s27, %s1667_s11 }
  0x26   : > { %p1378_p13 = por %p1377_p11, %p1376_p3 }
  0x27   : > { %p1374_p10 = pneg %p1373_p9 }
  0x28   : > { %p1380_p1 = por %p1379_p0, %p1378_p13 }
  0x2a   : > { %p1381_p5 = pnand %p1380_p1, %p1374_p10 }
  0x2c   : > { %1384 = shalt.err (!%p1381_p5)
}
  0x2d   : > { %s1385_s16 = scalar_lea.vmem %s1669_s8, 1024  ;;  %s1524_s20 = smov [#allocation6]  }
  0x2e   : > { %p1386_p6 = scmp.ne.s32.totalorder %s1669_s8, %s1385_s16  ;;  %s1390_s7 = sshll.u32 %s1524_s20, 4  ;;  %s1391_s7 = int_to_ptr.vmem [resolvable:$false] %s1390_s7 }
  0x2f   : > { %s1392_s10 = scalar_lea.vmem %s1391_s7, 2048  ;;  %p1393_p12 = scmp.lt.s32.totalorder %s1669_s8, %s1391_s7 }
  0x30   : > { %p1388_p9 = pnand %p1386_p6, %p1372_p8  ;;  %p1394_p3 = scmp.lt.s32.totalorder %s1392_s10, %s1385_s16 }
  0x32   : > { %p1389_p2 = pneg %p1388_p9  ;;  %p1395_p11 = por %p1394_p3, %p1393_p12 }
  0x34   : > { %p1396_p13 = pnand %p1395_p11, %p1389_p2 }
  0x36   : > { %1399 = shalt.err (!%p1396_p13)
}
  0x37   : > { %s1525_s27 = smov 256   ;;  %s1526_s6 = smov 16  }
  0x38   : > { %1191 = dma.hbm_to_vmem [thread:$0]  (!%p1673_p4), %s1667_s11, 1024, %s1669_s8, %s1678_s30, %s1525_s27, %s1525_s27, %s1526_s6  }
  0x39   : > { %p196_p5 = scmp.lt.s32.totalorder %s1522_s26, 5  ;;  %p2012_p8 = scmp.ge.s32.totalorder %s1522_s26, 1 }
  0x3b   : > { %p197_p10 = pnand %p2012_p8, %p196_p5 }
  0x3c   : > { %s202_s5 = sand.u32 (!%p197_p10), 1, %s1498_s21  }
  0x3d   : > { %200 = sbr.rel (%p197_p10) target bundleno = 1294 (0x50e), region = 36  ;;  %s1089_s16 = sshll.u32 (!%p197_p10), %s202_s5, 6 }
  0x3e   : > { %s203_s20 = scalar_lea.sflag (!%p197_p10), [#allocation7], %s202_s5  ;;  %s1710_s7 = scalar_lea.vmem (!%p197_p10), [#allocation6], %s1089_s16 }
  0x44   : > { %1473 = dma.done.wait (%p1637_p7), %s203_s20, 1024  }
  0x45   : > { %1475 = vsyncadd (%p1637_p7), %s203_s20, 4294966272  ;;  %s228_s28 = sand.u32 1, %s1486_s18   ;;  %p1091_p12 = scmp.ne.s32.totalorder %s1506_s23, 0 }
  0x46   : > { %s1090_s30 = sshll.u32 %s228_s28, 5  ;;  %v236_v0 = vld [vmem:[%s1710_s7 + $0x8] sm:$0xff] (!%p1091_p12)  ;;  %v238_v1 = vld [vmem:[%s1710_s7 + $0x18] sm:$0xff] (!%p1091_p12)  ;;  %v235_v2 = vld [vmem:[%s1710_s7] sm:$0xff] (!%p1091_p12)  ;;  %v1527_v7 = vmov (!%p1091_p12), 0.0   ;;  %v1528_v8 = vmov (!%p1091_p12), 0  }
  0x47   : > { %s1719_s11 = scalar_lea.vmem [#allocation9], %s1090_s30  ;;  %234 = sbr.rel (%p1091_p12) target bundleno = 461 (0x1cd), region = 44  ;;  %v1124_v3 = vpack.c.bf16 (!%p1091_p12), %v238_v1, %v236_v0  ;;  %v237_v4 = vld [vmem:[%s1710_s7 + $0x10] sm:$0xff] (!%p1091_p12)  ;;  %v240_v5 = vld [vmem:[%s1710_s7 + $0x28] sm:$0xff] (!%p1091_p12)  ;;  %v242_v6 = vld [vmem:[%s1710_s7 + $0x38] sm:$0xff] (!%p1091_p12)  ;;  %358 = vmatprep.mubr.f32.mxu0 (!%p1091_p12), %v1527_v7  ;;  %1295 = vset.pattern.permute.xlu0 (!%p1091_p12), %v1528_v8  ;;  %vm278_vm0 = vcmask (!%p1091_p12), 261120  }
  0x48   : > { %v1126_v9 = vpack.c.bf16 (!%p1091_p12), %v237_v4, %v235_v2  ;;  %v1128_v10 = vpack.c.bf16 (!%p1091_p12), %v242_v6, %v240_v5  ;;  %v239_v11 = vld [vmem:[%s1710_s7 + $0x20] sm:$0xff] (!%p1091_p12)  ;;  %v241_v12 = vld [vmem:[%s1710_s7 + $0x30] sm:$0xff] (!%p1091_p12)  ;;  %376 = vmatprep.mubr.f32.mxu1 (!%p1091_p12), %v1527_v7  ;;  %1296 = vset.pattern.permute.xlu1 (!%p1091_p12), %v1528_v8  ;;  %v246_v16 = vld [vmem:[%s2001_s2 + $0x18] sm:$0xff] (!%p1091_p12)  ;;  %vm391_vm1 = vcmask (!%p1091_p12), 1043456   ;;  %vm417_vm2 = vcmask (!%p1091_p12), 1047556  }
  0x49   : > { %1125 = vmatprep.subr.bf16.mxu0 (!%p1091_p12), %v1124_v3  ;;  %v248_v13 = vld [vmem:[%s2002_s3] sm:$0xff] (!%p1091_p12)  ;;  %1164 = vmatprep.subr.bf16.mxu1 (!%p1091_p12), %v1124_v3  ;;  %v1130_v14 = vpack.c.bf16 (!%p1091_p12), %v241_v12, %v239_v11  ;;  %v244_v17 = vld [vmem:[%s2001_s2 + $0x8] sm:$0xff] (!%p1091_p12)  ;;  %v245_v19 = vld [vmem:[%s2001_s2 + $0x10] sm:$0xff] (!%p1091_p12)  ;;  %v440_v11 = vlaneseq (!%p1091_p12)  ;;  %v1529_v12 = vmov (!%p1091_p12), 1.0  }
  0x4a   : > { %1127 = vmatpush1.bf16.msra.mxu0 (!%p1091_p12), %v1126_v9  ;;  %255 = vperm.xlu0 (!%p1091_p12), %1295, %v248_v13   ;;  %v243_v15 = vld [vmem:[%s2001_s2] sm:$0xff] (!%p1091_p12)  ;;  %v249_v20 = vld [vmem:[%s2002_s3 + $0x8] sm:$0xff] (!%p1091_p12)  ;;  %v250_v21 = vld [vmem:[%s2002_s3 + $0x10] sm:$0xff] (!%p1091_p12) }
  0x4b   : > { %1129 = vmatprep.subr.bf16.mxu0 (!%p1091_p12), %v1128_v10  ;;  %1166 = vmatpush1.bf16.msra.mxu1 (!%p1091_p12), %v1126_v9  ;;  %v247_v18 = vld [vmem:[%s2001_s2 + $0x20] sm:$0xff] (!%p1091_p12)  ;;  %v251_v22 = vld [vmem:[%s2002_s3 + $0x18] sm:$0xff] (!%p1091_p12)  ;;  %vm442_vm3 = vcmp.lt.s32.totalorder (!%p1091_p12), %v440_v11, 256 }
  0x4c   : > { %1165 = vmatprep.subr.bf16.mxu1 (!%p1091_p12), %v1128_v10  ;;  %260 = vperm.xlu1 (!%p1091_p12), %1296, %v249_v20   ;;  %v252_v23 = vld [vmem:[%s2002_s3 + $0x20] sm:$0xff] (!%p1091_p12)  ;;  %445 = vst.msk [vmem:[#allocation4 + $0x40] ss:$8 sm:$0x3] (!%p1091_p12), %vm442_vm3, %v1529_v12 }
  0x4e   : > { %1131 = vmatpush1.bf16.msra.mxu0 %v1130_v14 }
  0x4f   : > { %1167 = vmatpush1.bf16.msra.mxu1 %v1130_v14 }
  0x50   : > { %265 = vperm.xlu1 %1296, %v250_v21  }
  0x51   : > { %1092 = vmatmul.mubr.msk.f32.vlgmr.msra.gmra.mrb[0].mxu0 %vm278_vm0, %v243_v15 }
  0x52   : > { %364 = vmatprep.mubr.f32.mxu0 %v1527_v7  ;;  %1095 = vmatmul.mubr.msk.f32.vlgmr.msra.gmra.mrb[0].mxu1 %vm278_vm0, %v246_v16 }
  0x53   : > { %382 = vmatprep.mubr.f32.mxu1 %v1527_v7 }
  0x54   : > { %270 = vperm.xlu1 %1296, %v251_v22  }
  0x55   : > { %1093 = vmatmul.mubr.msk.f32.gmra.mrb[2].mxu0 %vm278_vm0, %v244_v17 }
  0x56   : > { %370 = vmatprep.mubr.f32.mxu0 %v1527_v7  ;;  %1096 = vmatmul.mubr.msk.f32.gmra.mrb[2].mxu1 %vm278_vm0, %v247_v18 }
  0x58   : > { %275 = vperm.xlu1 %1296, %v252_v23  }
  0x59   : > { %1094 = vmatmul.mubr.msk.f32.gmra.mrb[4].mxu0 %vm278_vm0, %v245_v19 }
  0xc9   : > { %v256_v24 = vpop.permute.xlu0 %255 }
  0xcb   : > { %v261_v46 = vpop.permute.xlu1 %260 }
  0xcf   : > { %v266_v52 = vpop.permute.xlu1 %265 }
  0xd3   : > { %v271_v55 = vpop.permute.xlu1 %270 }
  0xd7   : > { %v276_v61 = vpop.permute.xlu1 %275 }
 0x124   : > { %v360_v25 = vpop.f32.mrb[0].mxu0 }
 0x125   : > { %v1760_v26 = vadd.f32 %v360_v25, %v256_v24  ;;  %v362_v27 = vpop.f32.mrb[1].mxu0  ;;  %v378_v28 = vpop.f32.mrb[0].mxu1 }
 0x126   : > { %v1762_v29 = vadd.f32 %v362_v27, %v256_v24  ;;  %v379_v56 = vadd.f32 %v378_v28, %v271_v55  ;;  %v380_v58 = vpop.f32.mrb[1].mxu1 }
 0x127   : > { %v389_v30 = vmul.f32 %v1760_v26, %v1760_v26  ;;  %v381_v0 = vadd.f32 %v380_v58, %v271_v55 }
 0x128   : > { %v390_v31 = vmul.f32 %v1762_v29, %v1762_v29  ;;  %v366_v32 = vpop.f32.mrb[2].mxu0  ;;  %436 = vst [vmem:[#allocation4 + $0x20] sm:$0xff] %v379_v56 }
 0x129   : > { %v418_v33 = vsel %vm417_vm2, %v389_v30, 0.0  ;;  %v392_v34 = vsel %vm391_vm1, %v389_v30, 0.0  ;;  %v367_v48 = vadd.f32 %v366_v32, %v261_v46  ;;  %v368_v57 = vpop.f32.mrb[3].mxu0  ;;  %v384_v60 = vpop.f32.mrb[2].mxu1  ;;  %437 = vst [vmem:[#allocation4 + $0x28] sm:$0xff] %v381_v0 }
 0x12a   : > { %v399_v35 = vsel %vm391_vm1, %v390_v31, 0.0  ;;  %v419_v36 = vsel %vm417_vm2, %v390_v31, 0.0  ;;  %v393_v37 = vrot.slane %v392_v34, 4  ;;  %v369_v63 = vadd.f32 %v368_v57, %v261_v46  ;;  %v386_v3 = vpop.f32.mrb[3].mxu1 }
 0x12b   : > { %v400_v38 = vrot.slane %v399_v35, 4  ;;  %v420_v39 = vadd.f32 %v419_v36, %v418_v33  ;;  %432 = vst [vmem:[#allocation4] sm:$0xff] %v367_v48  ;;  %v385_v2 = vadd.f32 %v384_v60, %v276_v61  ;;  %v387_v5 = vadd.f32 %v386_v3, %v276_v61 }
 0x12c   : > { %v394_v40 = vadd.f32 %v393_v37, %v392_v34  ;;  %v372_v59 = vpop.f32.mrb[4].mxu0  ;;  %433 = vst [vmem:[#allocation4 + $0x8] sm:$0xff] %v369_v63 }
 0x12d   : > { %v401_v41 = vadd.f32 %v400_v38, %v399_v35  ;;  %421 = vadd.xlane.f32.xlu0 %v420_v39  ;;  %v374_v62 = vpop.f32.mrb[5].mxu0  ;;  %v373_v1 = vadd.f32 %v372_v59, %v266_v52  ;;  %438 = vst [vmem:[#allocation4 + $0x30] sm:$0xff] %v385_v2  ;;  %439 = vst [vmem:[#allocation4 + $0x38] sm:$0xff] %v387_v5 }
 0x12e   : > { %v395_v42 = vrot.slane %v394_v40, 2  ;;  %v375_v4 = vadd.f32 %v374_v62, %v266_v52 }
 0x12f   : > { %v402_v43 = vrot.slane %v401_v41, 2  ;;  %434 = vst [vmem:[#allocation4 + $0x10] sm:$0xff] %v373_v1 }
 0x130   : > { %v396_v44 = vadd.f32 %v395_v42, %v394_v40  ;;  %435 = vst [vmem:[#allocation4 + $0x18] sm:$0xff] %v375_v4 }
 0x131   : > { %v403_v45 = vadd.f32 %v402_v43, %v401_v41 }
 0x132   : > { %v397_v47 = vrot.slane %v396_v44, 1 }
 0x133   : > { %v404_v49 = vrot.slane %v403_v45, 1 }
 0x134   : > { %v398_v50 = vadd.f32 %v397_v47, %v396_v44 }
 0x135   : > { %v405_v51 = vadd.f32 %v404_v49, %v403_v45 }
 0x136   : > { %v406_v53 = vmax.f32 %v398_v50, 1e-24 }
 0x137   : > { %v407_v54 = vmax.f32 %v405_v51, 1e-24 }
 0x138   : > { %1297 = vrsqrt.f32 %v406_v53 }
 0x139   : > { %1299 = vrsqrt.f32 %v407_v54 }
 0x142   : > { %v1298_v6 = vpop.eup %1297 }
 0x143   : > { %v1300_v7 = vpop.eup %1299  ;;  %v410_v8 = vmul.f32 %v1298_v6, %v1760_v26 }
 0x144   : > { %v411_v9 = vmul.f32 %v1300_v7, %v1762_v29 }
 0x146   : > { %v414_v10 = vcombine.low %v410_v8, %v411_v9 }
 0x148   : > { %416 = vst [vmem:[#allocation2] sm:$0xff] %v414_v10 }
 0x1ba   : > { %v422_v13 = vpop.xlane.xlu0 %421 }
 0x1bb   : > { %v423_v14 = vmax.f32 %v422_v13, 1e-24 }
 0x1bd   : > { %1301 = vrsqrt.f32 %v423_v14 }
 0x1c7   : > { %v1302_v15 = vpop.eup %1301 }
 0x1c8   : > { %v425_v16 = vmul.f32 %v1302_v15, %v1760_v26  ;;  %v426_v17 = vmul.f32 %v1302_v15, %v1762_v29 }
 0x1ca   : > { %v429_v18 = vcombine.high %v425_v16, %v426_v17 }
 0x1cc   : > { %431 = vst [vmem:[#allocation3] sm:$0xff] %v429_v18 }
 0x1cd PF: > { %s1097_s10 = sshll.u32 %s1506_s23, 7  ;;  %vm537_vm4 = vcmask 1043456   ;;  %v1530_v21 = vmov 0.0   ;;  %vm488_vm5 = vcmask 31744   ;;  %s954_s16 = sld [smem:[#allocation5]] }
 0x1ce   : > { %s1773_s27 = sshra.s32 %s1097_s10, 7  ;;  %606 = vmatprep.mubr.f32.mxu0 %v1530_v21  ;;  %s1119_s20 = sshll.u32 %s1510_s24, 3 }
 0x1cf   : > { %s1098_s6 = sshll.u32 %s1773_s27, 2  ;;  %s1117_s30 = sshll.u32 %s1773_s27, 3 }
 0x1d0   : > { %s451_s5 = scalar_lea.vmem [#allocation2], %s1098_s6  ;;  %s988_s9 = sadd.s32 %s1506_s23, %s1119_s20 }
 0x1d1   : > { %v452_v22 = vld [vmem:[%s451_s5] sm:$0xf]  ;;  %s949_s8 = scalar_lea.vmem %s1710_s7, %s1117_s30 [#allocation6]  ;;  %s1120_s10 = sshll.u32 %s988_s9, 7 }
 0x1d2   : > { %454 = vxpose.xlu0.b32.start.end [1/1] (short) %v452_v22, 128  ;;  %s991_s6 = sshll.u32 %s1719_s11, 4  ;;  %s1928_s7 = scalar_lea.hbm %s2003_s4, %s1120_s10  ;;  %s1930_s6 = int_to_ptr.vmem [resolvable:$true] %s991_s6 }
 0x1d3   : > { %v453_v19 = vld [vmem:[#allocation3] sm:$0xff]  ;;  %s1938_s27 = scalar_lea.sflag [#allocation8], %s228_s28  ;;  %s1400_s5 = scalar_lea.vmem %s1930_s6, 512 }
 0x1d4   : > { %v487_v20 = vcombine.high %v453_v19, %v453_v19  ;;  %p1401_p7 = scmp.ne.s32.totalorder %s1930_s6, %s1400_s5  ;;  %p2013_p2 = scmp.ne.s32.totalorder %s2009_s12, 0 }
 0x1d6   : > { %1099 = vmatprep.subr.msk.mxu0 %vm537_vm4, %v487_v20  ;;  %p1402_p4 = pnand %p1401_p7, %p2013_p2 }
 0x1d7   : > { %1100 = vmatpush1.msk.msra.mxu0 %vm537_vm4, %v453_v19 }
 0x1d8   : > { %p1403_p0 = pneg %p1402_p4 }
 0x252   : > { %v470_v23 = vpop.trf.xlu0 }
 0x253   : > { %1101 = vmatmul.mubr.msk.f32.vlgmr.msra.gmra.mrb[0].mxu0 %vm488_vm5, %v470_v23  ;;  %v852_v23 = vld [vmem:[#allocation4 + $0x28] sm:$0xff] }
 0x254   : > { %612 = vmatprep.mubr.f32.mxu0 %v1530_v21  ;;  %931 = vmatprep.mubr.f32.mxu1 %v852_v23 }
 0x256   : > { %v471_v24 = vpop.trf.xlu0 }
 0x257   : > { %1102 = vmatmul.mubr.msk.f32.gmra.mrb[2].mxu0 %vm488_vm5, %v471_v24  ;;  %v848_v24 = vld [vmem:[#allocation4 + $0x8] sm:$0xff] }
 0x258   : > { %618 = vmatprep.mubr.f32.mxu0 %v1530_v21 }
 0x25a   : > { %v472_v25 = vpop.trf.xlu0 }
 0x25b   : > { %1103 = vmatmul.mubr.msk.f32.gmra.mrb[4].mxu0 %vm488_vm5, %v472_v25 }
 0x25c   : > { %624 = vmatprep.mubr.f32.mxu0 %v1530_v21 }
 0x25e   : > { %v473_v26 = vpop.trf.xlu0 }
 0x25f   : > { %1104 = vmatmul.mubr.msk.f32.gmra.mrb[6].mxu0 %vm488_vm5, %v473_v26 }
 0x260   : > { %630 = vmatprep.mubr.f32.mxu0 %v1530_v21 }
 0x262   : > { %v474_v27 = vpop.trf.xlu0 }
 0x263   : > { %1105 = vmatmul.mubr.msk.f32.gmra.mrb[8].mxu0 %vm488_vm5, %v474_v27 }
 0x264   : > { %636 = vmatprep.mubr.f32.mxu0 %v1530_v21 }
 0x266   : > { %v475_v28 = vpop.trf.xlu0 }
 0x267   : > { %1106 = vmatmul.mubr.msk.f32.gmra.mrb[10].mxu0 %vm488_vm5, %v475_v28 }
 0x268   : > { %642 = vmatprep.mubr.f32.mxu0 %v1530_v21 }
 0x26a   : > { %v476_v29 = vpop.trf.xlu0 }
 0x26b   : > { %1107 = vmatmul.mubr.msk.f32.gmra.mrb[12].mxu0 %vm488_vm5, %v476_v29 }
 0x26c   : > { %648 = vmatprep.mubr.f32.mxu0 %v1530_v21 }
 0x26e   : > { %v477_v30 = vpop.trf.xlu0 }
 0x26f   : > { %1108 = vmatmul.mubr.msk.f32.gmra.mrb[14].mxu0 %vm488_vm5, %v477_v30 }
 0x270   : > { %654 = vmatprep.mubr.f32.mxu0 %v1530_v21 }
 0x272   : > { %v478_v31 = vpop.trf.xlu0 }
 0x273   : > { %1109 = vmatmul.mubr.msk.f32.gmra.mrb[16].mxu0 %vm488_vm5, %v478_v31 }
 0x274   : > { %660 = vmatprep.mubr.f32.mxu0 %v1530_v21 }
 0x276   : > { %v479_v32 = vpop.trf.xlu0 }
 0x277   : > { %1110 = vmatmul.mubr.msk.f32.gmra.mrb[18].mxu0 %vm488_vm5, %v479_v32 }
 0x278   : > { %666 = vmatprep.mubr.f32.mxu0 %v1530_v21 }
 0x27a   : > { %v480_v33 = vpop.trf.xlu0 }
 0x27b   : > { %1111 = vmatmul.mubr.msk.f32.gmra.mrb[20].mxu0 %vm488_vm5, %v480_v33 }
 0x27c   : > { %672 = vmatprep.mubr.f32.mxu0 %v1530_v21 }
 0x27e   : > { %v481_v34 = vpop.trf.xlu0 }
 0x27f   : > { %1112 = vmatmul.mubr.msk.f32.gmra.mrb[22].mxu0 %vm488_vm5, %v481_v34 }
 0x280   : > { %678 = vmatprep.mubr.f32.mxu0 %v1530_v21 }
 0x282   : > { %v482_v35 = vpop.trf.xlu0 }
 0x283   : > { %1113 = vmatmul.mubr.msk.f32.gmra.mrb[24].mxu0 %vm488_vm5, %v482_v35 }
 0x284   : > { %684 = vmatprep.mubr.f32.mxu0 %v1530_v21 }
 0x286   : > { %v483_v36 = vpop.trf.xlu0 }
 0x287   : > { %1114 = vmatmul.mubr.msk.f32.gmra.mrb[26].mxu0 %vm488_vm5, %v483_v36 }
 0x288   : > { %690 = vmatprep.mubr.f32.mxu0 %v1530_v21 }
 0x28a   : > { %v484_v37 = vpop.trf.xlu0 }
 0x28b   : > { %1115 = vmatmul.mubr.msk.f32.gmra.mrb[28].mxu0 %vm488_vm5, %v484_v37 }
 0x28c   : > { %696 = vmatprep.mubr.f32.mxu0 %v1530_v21 }
 0x28e   : > { %v485_v38 = vpop.trf.xlu0 }
 0x28f   : > { %1116 = vmatmul.mubr.msk.f32.gmra.mrb[30].mxu0 %vm488_vm5, %v485_v38 }
 0x290   : > { %921 = vmatprep.mubr.f32.mxu0 %v848_v24 }
 0x326   : > { %v1792_v39 = vpop.f32.mrb[0].mxu0 }
 0x327   : > { %v1794_v40 = vpop.f32.mrb[1].mxu0 }
 0x328   : > { %v703_v41 = vmax.f32 %v1792_v39, %v1794_v40 }
 0x32a   : > { %704 = vmax.xlane.f32.xlu0 %v703_v41  ;;  %v1798_v42 = vpop.f32.mrb[2].mxu0 }
 0x32b   : > { %v1800_v43 = vpop.f32.mrb[3].mxu0 }
 0x32c   : > { %v706_v44 = vmax.f32 %v1798_v42, %v1800_v43 }
 0x32e   : > { %707 = vmax.xlane.f32.xlu1 %v706_v44  ;;  %v1804_v45 = vpop.f32.mrb[4].mxu0 }
 0x32f   : > { %v1806_v46 = vpop.f32.mrb[5].mxu0 }
 0x330   : > { %v709_v47 = vmax.f32 %v1804_v45, %v1806_v46 }
 0x332   : > { %710 = vmax.xlane.f32.xlu1 %v709_v47  ;;  %v1810_v48 = vpop.f32.mrb[6].mxu0 }
 0x333   : > { %v1812_v49 = vpop.f32.mrb[7].mxu0 }
 0x334   : > { %v712_v50 = vmax.f32 %v1810_v48, %v1812_v49 }
 0x336   : > { %713 = vmax.xlane.f32.xlu1 %v712_v50  ;;  %v1816_v51 = vpop.f32.mrb[8].mxu0 }
 0x337   : > { %v1818_v52 = vpop.f32.mrb[9].mxu0 }
 0x338   : > { %v715_v53 = vmax.f32 %v1816_v51, %v1818_v52 }
 0x33a   : > { %716 = vmax.xlane.f32.xlu1 %v715_v53  ;;  %v1822_v54 = vpop.f32.mrb[10].mxu0 }
 0x33b   : > { %v1824_v55 = vpop.f32.mrb[11].mxu0 }
 0x33c   : > { %v718_v56 = vmax.f32 %v1822_v54, %v1824_v55 }
 0x33e   : > { %719 = vmax.xlane.f32.xlu1 %v718_v56  ;;  %v1828_v57 = vpop.f32.mrb[12].mxu0 }
 0x33f   : > { %v1830_v58 = vpop.f32.mrb[13].mxu0 }
 0x340   : > { %v721_v59 = vmax.f32 %v1828_v57, %v1830_v58 }
 0x342   : > { %722 = vmax.xlane.f32.xlu1 %v721_v59  ;;  %v1834_v60 = vpop.f32.mrb[14].mxu0 }
 0x343   : > { %v1836_v61 = vpop.f32.mrb[15].mxu0 }
 0x344   : > { %v724_v62 = vmax.f32 %v1834_v60, %v1836_v61 }
 0x346   : > { %725 = vmax.xlane.f32.xlu1 %v724_v62  ;;  %v1840_v63 = vpop.f32.mrb[16].mxu0 }
 0x347   : > { %v1842_v0 = vpop.f32.mrb[17].mxu0 }
 0x348   : > { %v727_v1 = vmax.f32 %v1840_v63, %v1842_v0 }
 0x34a   : > { %728 = vmax.xlane.f32.xlu1 %v727_v1  ;;  %v1846_v2 = vpop.f32.mrb[18].mxu0 }
 0x34b   : > { %v1848_v3 = vpop.f32.mrb[19].mxu0 }
 0x34c   : > { %v730_v4 = vmax.f32 %v1846_v2, %v1848_v3 }
 0x34e   : > { %731 = vmax.xlane.f32.xlu1 %v730_v4  ;;  %v1852_v5 = vpop.f32.mrb[20].mxu0 }
 0x34f   : > { %v1854_v6 = vpop.f32.mrb[21].mxu0 }
 0x350   : > { %v733_v7 = vmax.f32 %v1852_v5, %v1854_v6 }
 0x352   : > { %734 = vmax.xlane.f32.xlu1 %v733_v7  ;;  %v1858_v8 = vpop.f32.mrb[22].mxu0 }
 0x353   : > { %v1860_v9 = vpop.f32.mrb[23].mxu0 }
 0x354   : > { %v736_v10 = vmax.f32 %v1858_v8, %v1860_v9 }
 0x356   : > { %737 = vmax.xlane.f32.xlu1 %v736_v10  ;;  %v1864_v11 = vpop.f32.mrb[24].mxu0 }
 0x357   : > { %v1866_v12 = vpop.f32.mrb[25].mxu0 }
 0x358   : > { %v739_v13 = vmax.f32 %v1864_v11, %v1866_v12 }
 0x35a   : > { %740 = vmax.xlane.f32.xlu1 %v739_v13  ;;  %v1870_v14 = vpop.f32.mrb[26].mxu0 }
 0x35b   : > { %v1872_v15 = vpop.f32.mrb[27].mxu0 }
 0x35c   : > { %v742_v16 = vmax.f32 %v1870_v14, %v1872_v15 }
 0x35e   : > { %743 = vmax.xlane.f32.xlu1 %v742_v16  ;;  %v1876_v17 = vpop.f32.mrb[28].mxu0 }
 0x35f   : > { %v1878_v18 = vpop.f32.mrb[29].mxu0 }
 0x360   : > { %v745_v19 = vmax.f32 %v1876_v17, %v1878_v18 }
 0x362   : > { %746 = vmax.xlane.f32.xlu1 %v745_v19  ;;  %v1882_v20 = vpop.f32.mrb[30].mxu0 }
 0x363   : > { %v1884_v21 = vpop.f32.mrb[31].mxu0 }
 0x364   : > { %v748_v22 = vmax.f32 %v1882_v20, %v1884_v21 }
 0x366   : > { %749 = vmax.xlane.f32.xlu1 %v748_v22 }
 0x3b7   : > { %v705_v25 = vpop.xlane.xlu0 %704 }
 0x3b8   : > { %v751_v26 = vsub.f32 %v1792_v39, %v705_v25  ;;  %v752_v27 = vsub.f32 %v1794_v40, %v705_v25 }
 0x3ba   : > { %v783_v28 = vmul.f32 1.442695, %v751_v26  ;;  %v785_v29 = vmul.f32 1.442695, %v752_v27 }
 0x3bb   : > { %v708_v30 = vpop.xlane.xlu1 %707 }
 0x3bc   : > { %v753_v31 = vsub.f32 %v1798_v42, %v708_v30  ;;  %v754_v32 = vsub.f32 %v1800_v43, %v708_v30  ;;  %1304 = vpow2.f32 %v783_v28 }
 0x3bd   : > { %1306 = vpow2.f32 %v785_v29 }
 0x3be   : > { %v787_v33 = vmul.f32 1.442695, %v753_v31  ;;  %v789_v34 = vmul.f32 1.442695, %v754_v32 }
 0x3bf   : > { %v711_v35 = vpop.xlane.xlu1 %710 }
 0x3c0   : > { %1308 = vpow2.f32 %v787_v33  ;;  %v755_v36 = vsub.f32 %v1804_v45, %v711_v35  ;;  %v756_v37 = vsub.f32 %v1806_v46, %v711_v35 }
 0x3c1   : > { %1310 = vpow2.f32 %v789_v34 }
 0x3c2   : > { %v791_v38 = vmul.f32 1.442695, %v755_v36  ;;  %v793_v39 = vmul.f32 1.442695, %v756_v37 }
 0x3c3   : > { %v714_v40 = vpop.xlane.xlu1 %713 }
 0x3c4   : > { %v757_v41 = vsub.f32 %v1810_v48, %v714_v40  ;;  %v758_v42 = vsub.f32 %v1812_v49, %v714_v40  ;;  %1312 = vpow2.f32 %v791_v38 }
 0x3c5   : > { %1314 = vpow2.f32 %v793_v39 }
 0x3c6   : > { %v795_v43 = vmul.f32 1.442695, %v757_v41  ;;  %v797_v44 = vmul.f32 1.442695, %v758_v42  ;;  %v1305_v50 = vpop.eup %1304 }
 0x3c7   : > { %v717_v47 = vpop.xlane.xlu1 %716  ;;  %v1307_v46 = vpop.eup %1306 }
 0x3c8   : > { %1316 = vpow2.f32 %v795_v43  ;;  %v759_v53 = vsub.f32 %v1816_v51, %v717_v47  ;;  %v760_v45 = vsub.f32 %v1818_v52, %v717_v47 }
 0x3c9   : > { %1318 = vpow2.f32 %v797_v44 }
 0x3ca   : > { %v1309_v56 = vpop.eup %1308  ;;  %v799_v59 = vmul.f32 1.442695, %v759_v53  ;;  %v801_v1 = vmul.f32 1.442695, %v760_v45 }
 0x3cb   : > { %v1311_v62 = vpop.eup %1310  ;;  %v720_v48 = vpop.xlane.xlu1 %719  ;;  %v1134_v4 = vpack.c.bf16 %v1309_v56, %v1305_v50 }
 0x3cc   : > { %v761_v49 = vsub.f32 %v1822_v54, %v720_v48  ;;  %v762_v7 = vsub.f32 %v1824_v55, %v720_v48  ;;  %v1132_v10 = vpack.c.bf16 %v1311_v62, %v1307_v46  ;;  %1320 = vpow2.f32 %v799_v59 }
 0x3cd   : > { %1322 = vpow2.f32 %v801_v1 }
 0x3ce   : > { %v803_v13 = vmul.f32 1.442695, %v761_v49  ;;  %v805_v16 = vmul.f32 1.442695, %v762_v7  ;;  %1133 = vmatprep.subr.bf16.mxu0 %v1132_v10  ;;  %1168 = vmatprep.subr.bf16.mxu1 %v1132_v10  ;;  %v1313_v52 = vpop.eup %1312 }
 0x3cf   : > { %1135 = vmatpush1.bf16.xpose.msra.mxu0 %v1134_v4  ;;  %1176 = vmatpush1.bf16.xpose.msra.mxu1 %v1134_v4  ;;  %v723_v51 = vpop.xlane.xlu1 %722  ;;  %v1315_v23 = vpop.eup %1314 }
 0x3d0   : > { %1324 = vpow2.f32 %v803_v13  ;;  %v763_v19 = vsub.f32 %v1828_v57, %v723_v51  ;;  %v764_v22 = vsub.f32 %v1830_v58, %v723_v51 }
 0x3d1   : > { %1326 = vpow2.f32 %v805_v16 }
 0x3d2   : > { %v1317_v54 = vpop.eup %1316  ;;  %v807_v55 = vmul.f32 1.442695, %v763_v19  ;;  %v809_v25 = vmul.f32 1.442695, %v764_v22 }
 0x3d3   : > { %v1319_v24 = vpop.eup %1318  ;;  %v726_v26 = vpop.xlane.xlu1 %725  ;;  %v1138_v27 = vpack.c.bf16 %v1317_v54, %v1313_v52 }
 0x3d4   : > { %v765_v28 = vsub.f32 %v1834_v60, %v726_v26  ;;  %v766_v29 = vsub.f32 %v1836_v61, %v726_v26  ;;  %v1136_v30 = vpack.c.bf16 %v1319_v24, %v1315_v23  ;;  %1328 = vpow2.f32 %v807_v55 }
 0x3d5   : > { %1330 = vpow2.f32 %v809_v25 }
 0x3d6   : > { %v811_v31 = vmul.f32 1.442695, %v765_v28  ;;  %v813_v32 = vmul.f32 1.442695, %v766_v29  ;;  %1137 = vmatprep.subr.bf16.mxu0 %v1136_v30  ;;  %1169 = vmatprep.subr.bf16.mxu1 %v1136_v30  ;;  %v1321_v58 = vpop.eup %1320 }
 0x3d7   : > { %1139 = vmatpush1.bf16.xpose.msra.mxu0 %v1138_v27  ;;  %1177 = vmatpush1.bf16.xpose.msra.mxu1 %v1138_v27  ;;  %v729_v57 = vpop.xlane.xlu1 %728  ;;  %v1323_v35 = vpop.eup %1322 }
 0x3d8   : > { %1332 = vpow2.f32 %v811_v31  ;;  %v767_v33 = vsub.f32 %v1840_v63, %v729_v57  ;;  %v768_v34 = vsub.f32 %v1842_v0, %v729_v57 }
 0x3d9   : > { %1334 = vpow2.f32 %v813_v32 }
 0x3da   : > { %v1325_v60 = vpop.eup %1324  ;;  %v815_v61 = vmul.f32 1.442695, %v767_v33  ;;  %v817_v37 = vmul.f32 1.442695, %v768_v34 }
 0x3db   : > { %v1327_v36 = vpop.eup %1326  ;;  %v732_v38 = vpop.xlane.xlu1 %731  ;;  %v1142_v39 = vpack.c.bf16 %v1325_v60, %v1321_v58 }
 0x3dc   : > { %v769_v40 = vsub.f32 %v1846_v2, %v732_v38  ;;  %v770_v41 = vsub.f32 %v1848_v3, %v732_v38  ;;  %v1140_v42 = vpack.c.bf16 %v1327_v36, %v1323_v35  ;;  %1336 = vpow2.f32 %v815_v61 }
 0x3dd   : > { %1338 = vpow2.f32 %v817_v37 }
 0x3de   : > { %v819_v43 = vmul.f32 1.442695, %v769_v40  ;;  %v821_v44 = vmul.f32 1.442695, %v770_v41  ;;  %1141 = vmatprep.subr.bf16.mxu0 %v1140_v42  ;;  %1170 = vmatprep.subr.bf16.mxu1 %v1140_v42  ;;  %v1329_v0 = vpop.eup %1328  ;;  %v851_v41 = vld [vmem:[#allocation4 + $0x20] sm:$0xff] }
 0x3df   : > { %1143 = vmatpush1.bf16.xpose.msra.mxu0 %v1142_v39  ;;  %1178 = vmatpush1.bf16.xpose.msra.mxu1 %v1142_v39  ;;  %v735_v63 = vpop.xlane.xlu1 %734  ;;  %v1331_v53 = vpop.eup %1330  ;;  %v847_v42 = vld [vmem:[#allocation4] sm:$0xff] }
 0x3e0   : > { %1340 = vpow2.f32 %v819_v43  ;;  %v771_v47 = vsub.f32 %v1852_v5, %v735_v63  ;;  %v772_v50 = vsub.f32 %v1854_v6, %v735_v63  ;;  %v854_v43 = vld [vmem:[#allocation4 + $0x38] sm:$0xff]  ;;  %v853_v63 = vld [vmem:[#allocation4 + $0x30] sm:$0xff] }
 0x3e1   : > { %1342 = vpow2.f32 %v821_v44  ;;  %v850_v44 = vld [vmem:[#allocation4 + $0x18] sm:$0xff] }
 0x3e2   : > { %v1333_v2 = vpop.eup %1332  ;;  %v823_v3 = vmul.f32 1.442695, %v771_v47  ;;  %v825_v46 = vmul.f32 1.442695, %v772_v50  ;;  %v856_v47 = vld [vmem:[#allocation4 + $0x48] sm:$0x1] }
 0x3e3   : > { %v1335_v45 = vpop.eup %1334  ;;  %v738_v56 = vpop.xlane.xlu1 %737  ;;  %v1146_v59 = vpack.c.bf16 %v1333_v2, %v1329_v0  ;;  %v849_v0 = vld [vmem:[#allocation4 + $0x10] sm:$0xff]  ;;  %v855_v50 = vld [vmem:[#allocation4 + $0x40] sm:$0x1] }
 0x3e4   : > { %v773_v62 = vsub.f32 %v1858_v8, %v738_v56  ;;  %v774_v1 = vsub.f32 %v1860_v9, %v738_v56  ;;  %v1144_v48 = vpack.c.bf16 %v1335_v45, %v1331_v53  ;;  %1344 = vpow2.f32 %v823_v3 }
 0x3e5   : > { %1346 = vpow2.f32 %v825_v46 }
 0x3e6   : > { %v827_v4 = vmul.f32 1.442695, %v773_v62  ;;  %v829_v49 = vmul.f32 1.442695, %v774_v1  ;;  %1145 = vmatprep.subr.bf16.mxu0 %v1144_v48  ;;  %1171 = vmatprep.subr.bf16.mxu1 %v1144_v48  ;;  %v1337_v6 = vpop.eup %1336  ;;  %v955_v48 = vlaneseq }
 0x3e7   : > { %1147 = vmatpush1.bf16.xpose.msra.mxu0 %v1146_v59  ;;  %1179 = vmatpush1.bf16.xpose.msra.mxu1 %v1146_v59  ;;  %v741_v5 = vpop.xlane.xlu1 %740  ;;  %v1339_v13 = vpop.eup %1338 }
 0x3e8   : > { %1348 = vpow2.f32 %v827_v4  ;;  %v775_v7 = vsub.f32 %v1864_v11, %v741_v5  ;;  %v776_v10 = vsub.f32 %v1866_v12, %v741_v5 }
 0x3e9   : > { %1350 = vpow2.f32 %v829_v49  ;;  %v956_v49 = vshrl.u32 %v955_v48, 7 }
 0x3ea   : > { %v1341_v8 = vpop.eup %1340  ;;  %v831_v9 = vmul.f32 1.442695, %v775_v7  ;;  %v833_v51 = vmul.f32 1.442695, %v776_v10  ;;  %v963_v10 = vstv %s954_s16  ;;  %s1531_s16 = smov [#allocation9]  }
 0x3eb   : > { %v1343_v16 = vpop.eup %1342  ;;  %v744_v52 = vpop.xlane.xlu1 %743  ;;  %v1150_v19 = vpack.c.bf16 %v1341_v8, %v1337_v6  ;;  %v957_v5 = vsub.s32 0, %v956_v49  ;;  %s1404_s20 = sshll.u32 %s1531_s16, 4  ;;  %s1405_s20 = int_to_ptr.vmem [resolvable:$false] %s1404_s20 }
 0x3ec   : > { %v777_v22 = vsub.f32 %v1870_v14, %v744_v52  ;;  %v778_v23 = vsub.f32 %v1872_v15, %v744_v52  ;;  %v1148_v54 = vpack.c.bf16 %v1343_v16, %v1339_v13  ;;  %1352 = vpow2.f32 %v831_v9  ;;  %v952_v13 = vld [vmem:[%s949_s8 + $0x20] sm:$0xff]  ;;  %v953_v52 = vld [vmem:[%s949_s8 + $0x30] sm:$0xff]  ;;  %s1406_s30 = scalar_lea.vmem %s1405_s20, 1024  ;;  %p1407_p1 = scmp.lt.s32.totalorder %s1930_s6, %s1405_s20 }
 0x3ed   : > { %1354 = vpow2.f32 %v833_v51  ;;  %p1408_p6 = scmp.lt.s32.totalorder %s1406_s30, %s1400_s5 }
 0x3ee   : > { %v835_v55 = vmul.f32 1.442695, %v777_v22  ;;  %v837_v24 = vmul.f32 1.442695, %v778_v23  ;;  %1149 = vmatprep.subr.bf16.mxu0 %v1148_v54  ;;  %1172 = vmatprep.subr.bf16.mxu1 %v1148_v54  ;;  %v1345_v12 = vpop.eup %1344  ;;  %v951_v22 = vld [vmem:[%s949_s8 + $0x10] sm:$0xff] }
 0x3ef   : > { %1151 = vmatpush1.bf16.xpose.msra.mxu0 %v1150_v19  ;;  %1180 = vmatpush1.bf16.xpose.msra.mxu1 %v1150_v19  ;;  %v747_v11 = vpop.xlane.xlu1 %746  ;;  %v1347_v27 = vpop.eup %1346  ;;  %v950_v19 = vld [vmem:[%s949_s8] sm:$0xff]  ;;  %p1409_p9 = por %p1408_p6, %p1407_p1 }
 0x3f0   : > { %1356 = vpow2.f32 %v835_v55  ;;  %v779_v25 = vsub.f32 %v1876_v17, %v747_v11  ;;  %v780_v26 = vsub.f32 %v1878_v18, %v747_v11 }
 0x3f1   : > { %1358 = vpow2.f32 %v837_v24  ;;  %p1410_p3 = pnand %p1409_p9, %p1403_p0 }
 0x3f2   : > { %v1349_v14 = vpop.eup %1348  ;;  %v839_v15 = vmul.f32 1.442695, %v779_v25  ;;  %v841_v29 = vmul.f32 1.442695, %v780_v26 }
 0x3f3   : > { %v1351_v28 = vpop.eup %1350  ;;  %v750_v30 = vpop.xlane.xlu1 %749  ;;  %v1154_v31 = vpack.c.bf16 %v1349_v14, %v1345_v12 }
 0x3f4   : > { %v781_v32 = vsub.f32 %v1882_v20, %v750_v30  ;;  %v782_v57 = vsub.f32 %v1884_v21, %v750_v30  ;;  %v1152_v58 = vpack.c.bf16 %v1351_v28, %v1347_v27  ;;  %1360 = vpow2.f32 %v839_v15 }
 0x3f5   : > { %1362 = vpow2.f32 %v841_v29 }
 0x3f6   : > { %v843_v33 = vmul.f32 1.442695, %v781_v32  ;;  %v845_v34 = vmul.f32 1.442695, %v782_v57  ;;  %1153 = vmatprep.subr.bf16.mxu0 %v1152_v58  ;;  %1173 = vmatprep.subr.bf16.mxu1 %v1152_v58  ;;  %v1353_v17 = vpop.eup %1352 }
 0x3f7   : > { %1155 = vmatpush1.bf16.xpose.msra.mxu0 %v1154_v31  ;;  %1181 = vmatpush1.bf16.xpose.msra.mxu1 %v1154_v31  ;;  %v1355_v18 = vpop.eup %1354 }
 0x3f8   : > { %1364 = vpow2.f32 %v843_v33 }
 0x3f9   : > { %1366 = vpow2.f32 %v845_v34 }
 0x3fa   : > { %v1357_v35 = vpop.eup %1356 }
 0x3fb   : > { %v1359_v60 = vpop.eup %1358  ;;  %v1158_v61 = vpack.c.bf16 %v1357_v35, %v1353_v17 }
 0x3fc   : > { %v1156_v36 = vpack.c.bf16 %v1359_v60, %v1355_v18 }
 0x3fe   : > { %1157 = vmatprep.subr.bf16.mxu0 %v1156_v36  ;;  %1174 = vmatprep.subr.bf16.mxu1 %v1156_v36  ;;  %v1361_v20 = vpop.eup %1360 }
 0x3ff   : > { %1159 = vmatpush1.bf16.xpose.msra.mxu0 %v1158_v61  ;;  %1182 = vmatpush1.bf16.xpose.msra.mxu1 %v1158_v61  ;;  %v1363_v21 = vpop.eup %1362 }
 0x402   : > { %v1365_v37 = vpop.eup %1364 }
 0x403   : > { %v1367_v38 = vpop.eup %1366  ;;  %v1162_v39 = vpack.c.bf16 %v1365_v37, %v1361_v20 }
 0x404   : > { %v1160_v40 = vpack.c.bf16 %v1367_v38, %v1363_v21 }
 0x406   : > { %1161 = vmatprep.subr.bf16.mxu0 %v1160_v40  ;;  %1175 = vmatprep.subr.bf16.mxu1 %v1160_v40 }
 0x407   : > { %1163 = vmatpush1.bf16.xpose.msra.mxu0 %v1162_v39  ;;  %1183 = vmatpush1.bf16.xpose.msra.mxu1 %v1162_v39 }
 0x40e   : > { %932 = vmatmul.mubr.f32.vlgmr.msra.gmra.mrb[0].mxu1 %v851_v41  ;;  %922 = vmatmul.mubr.f32.vlgmr.msra.gmra.mrb[32].mxu0 %v847_v42 }
 0x40f   : > { %936 = vmatprep.mubr.f32.mxu1 %v854_v43  ;;  %926 = vmatprep.mubr.f32.mxu0 %v850_v44 }
 0x412   : > { %937 = vmatmul.mubr.f32.gmra.mrb[2].mxu1 %v853_v63  ;;  %927 = vmatmul.mubr.f32.gmra.mrb[34].mxu0 %v849_v0 }
 0x413   : > { %941 = vmatprep.mubr.f32.mxu1 %v856_v47 }
 0x416   : > { %942 = vmatmul.mubr.f32.gmra.mrb[4].mxu1 %v855_v50 }
 0x4e1   : > { %v933_v53 = vpop.f32.mrb[0].mxu1  ;;  %v923_v2 = vpop.f32.mrb[32].mxu0 }
 0x4e2   : > { %v935_v3 = vpop.f32.mrb[1].mxu1  ;;  %v925_v45 = vpop.f32.mrb[33].mxu0 }
 0x4e5   : > { %v938_v46 = vpop.f32.mrb[2].mxu1  ;;  %v928_v56 = vpop.f32.mrb[34].mxu0 }
 0x4e6   : > { %v940_v59 = vpop.f32.mrb[3].mxu1  ;;  %v930_v62 = vpop.f32.mrb[35].mxu0 }
 0x4e9   : > { %v943_v1 = vpop.f32.mrb[4].mxu1 }
 0x4ea   : > { %1368 = vrcp.f32 %v943_v1  ;;  %v945_v4 = vpop.f32.mrb[5].mxu1 }
 0x4f4   : > { %v1369_v6 = vpop.eup %1368 }
 0x4f5   : > { %v958_v7 = vrot.slane %v1369_v6, %v957_v5 }
 0x4f7   : > { %v959_v8 = vmul.f32 %v958_v7, %v923_v2  ;;  %v961_v9 = vmul.f32 %v958_v7, %v933_v53  ;;  %v962_v16 = vmul.f32 %v958_v7, %v938_v46  ;;  %v960_v51 = vmul.f32 %v958_v7, %v928_v56 }
 0x4f9   : > { %v964_v23 = vmul.f32 %v963_v10, %v959_v8  ;;  %v966_v54 = vmul.f32 %v963_v10, %v961_v9  ;;  %v967_v55 = vmul.f32 %v963_v10, %v962_v16  ;;  %v965_v24 = vmul.f32 %v963_v10, %v960_v51 }
 0x4fb   : > { %v968_v11 = vadd.f32 %v964_v23, %v950_v19  ;;  %v970_v12 = vadd.f32 %v966_v54, %v952_v13  ;;  %v971_v25 = vadd.f32 %v967_v55, %v953_v52  ;;  %v969_v26 = vadd.f32 %v965_v24, %v951_v22 }
 0x4fd   : > { %972 = vst [vmem:[%s1719_s11] sm:$0xff] %v968_v11  ;;  %974 = vst [vmem:[%s1719_s11 + $0x10] sm:$0xff] %v970_v12 }
 0x4fe   : > { %975 = vst [vmem:[%s1719_s11 + $0x18] sm:$0xff] %v971_v25  ;;  %973 = vst [vmem:[%s1719_s11 + $0x8] sm:$0xff] %v969_v26 }
 0x4ff   : > { %1413 = shalt.err (!%p1410_p3)
}
 0x500   : > { %s1414_s28 = scalar_lea.hbm %s1928_s7, 512  ;;  %s1418_s8 = scalar_lea.hbm %s2003_s4, 2048 }
 0x501   : > { %p1415_p11 = scmp.ne.s32.totalorder %s1928_s7, %s1414_s28  ;;  %p1419_p8 = scmp.lt.u32.totalorder %s1928_s7, %s2003_s4 }
 0x502   : > { %p1420_p10 = scmp.lt.u32.totalorder %s1418_s8, %s1414_s28  ;;  %p1422_p7 = scmp.lt.u32.totalorder %s1414_s28, %s1928_s7 }
 0x503   : > { %p1416_p13 = pnand %p1415_p11, %p2013_p2 }
 0x504   : > { %p1421_p12 = por %p1420_p10, %p1419_p8 }
 0x505   : > { %p1417_p5 = pneg %p1416_p13 }
 0x506   : > { %p1423_p4 = por %p1422_p7, %p1421_p12 }
 0x508   : > { %p1424_p0 = pnand %p1423_p4, %p1417_p5 }
 0x50a   : > { %1427 = shalt.err (!%p1424_p0)
}
 0x50b   : > { %s1532_s24 = smov 128   ;;  %s1533_s5 = smov 256  }
 0x50c   : > { %s1534_s16 = smov 8  }
 0x50d   : > { %1186 = dma.vmem_to_hbm [thread:$0]  (%p2013_p2), %s1930_s6, 512, %s1928_s7, %s1938_s27, %s1532_s24, %s1533_s5, %s1534_s16  }
 0x50e PF: > { %p1197_p1 = scmp.ge.s32.totalorder %s1522_s26, 2  ;;  %s1006_s20 = sand.u32 1, %s1482_s17  }
 0x50f   : > { %p2014_p6 = scmp.ne.s32.totalorder %s2010_s15, 0  ;;  %s1007_s30 = scalar_lea.sflag [#allocation8], %s1006_s20 }
 0x511   : > { %p1193_p9 = pnand %p1197_p1, %p2014_p6 }
 0x513   : > { %1477 = dma.done.wait (!%p1193_p9), %s1007_s30, 512  }
 0x514   : > { %1479 = vsyncadd (!%p1193_p9), %s1007_s30, 4294966784  ;;  %s21_s26 = sadd.s32 1, %s1522_s26   ;;  %s2015_s12 = sld [smem:[#allocation12_spill]] }
 0x515   : > { %p18_p3 = scmp.ge.s32.totalorder %s21_s26, 6   ;;  %s2016_s17 = smov %s1486_s18 }
 0x516   : > { %s2017_s18 = smov %s1490_s19  ;;  %s2018_s19 = smov %s1653_s14 }
 0x517   : > { %s2019_s20 = smov %s1498_s21  ;;  %s2020_s21 = smov %s1502_s22 }
 0x518   : > { %s2021_s22 = smov %s1650_s13  ;;  %s2022_s23 = smov %s1514_s0 }
 0x519   : > { %s2023_s24 = smov %s1518_s25  ;;  %s2024_s0 = smov %s2027_s29 }
 0x51a   : > { %s2025_s25 = smov %s2015_s12  ;;  %20 = sbr.rel (!%p18_p3) target bundleno = 11 (0xb), region = 88 }
 0x521   :  { %1012 = vsyncpa [#allocation7], 1 }
 0x522   :  { %1014 = vsyncpa [#allocation7 + $0x1], 1 }
 0x523   :  { %1015 = vsyncpa [#allocation8], 1 }
 0x524   :  { %1017 = vsyncpa [#allocation8 + $0x1], 1 }

</bundles_post_ra>
